<compile_context>
chip_gen: v7x
topology: tpu7x:2x2x1
jax: 0.10.0
libtpu: 0.0.40
codegen_flags: <defaults>
</compile_context>

<pallas_src>
import functools

import jax
import jax.numpy as jnp
from jax.experimental import pallas as pl
from jax.experimental.pallas import tpu as pltpu


def _round_up(x, m):
    return ((x + m - 1) // m) * m


def _is_v5():
    try:
        return "v5" in jax.devices()[0].device_kind.lower()
    except Exception:
        return False


# --------------------------------------------------------------------------- #
# Kernels
# --------------------------------------------------------------------------- #

def _rows_first_kernel(a_ref, img_ref, bt_ref, o_ref, img_bf16_ref):
    # a_ref       : (TH, H_in)       bf16 row weights, 1/255 to_tensor scale folded in
    # img_ref     : (1, H_in, W_in)  uint8 channel (same block for every row tile)
    # bt_ref      : (W_in, W_pad)    bf16 col weights, transposed + lane padded
    # o_ref       : (1, TH, W_pad)   f32 output tile in [0, 1]
    # img_bf16_ref: (H_in, W_in)     bf16 scratch: the channel cast, done once per channel
    @pl.when(pl.program_id(1) == 0)
    def _():
        # Hoisted cast: uint8 -> f32 -> bf16 (0..255 exact in bf16), done once per
        # channel and reused by every row tile (row axis is 'arbitrary').
        img_bf16_ref[...] = img_ref[0].astype(jnp.float32).astype(jnp.bfloat16)

    tmp = jnp.dot(a_ref[...], img_bf16_ref[...], preferred_element_type=jnp.float32)
    o_ref[0] = jnp.dot(tmp.astype(jnp.bfloat16), bt_ref[...],
                       preferred_element_type=jnp.float32)


def _cols_first_kernel(a_ref, img_ref, bt_ref, o_ref, colres_ref):
    # Column contraction first (fewer MACs for strong width-downscale / height-upscale):
    # colres = cast(img) @ Bt is computed once per channel; each row tile is A_tile @ colres.
    @pl.when(pl.program_id(1) == 0)
    def _():
        img = img_ref[0].astype(jnp.float32).astype(jnp.bfloat16)
        colres_ref[...] = jnp.dot(img, bt_ref[...],
                                  preferred_element_type=jnp.float32).astype(jnp.bfloat16)

    o_ref[0] = jnp.dot(a_ref[...], colres_ref[...], preferred_element_type=jnp.float32)


# --------------------------------------------------------------------------- #
# Weights / geometry (host-side glue)
# --------------------------------------------------------------------------- #

def _bilinear_weights(out_size, in_size):
    """Dense (out_size, in_size) f32 bilinear matrix (align_corners=False).

    Built with one-hot compare+select (cheap VPU ops) instead of .at[].add
    scatter, which lowers to a slow serialized XLA scatter on TPU.
    """
    scale = in_size / out_size
    i = jnp.arange(out_size, dtype=jnp.float32)
    src = jnp.clip((i + 0.5) * scale - 0.5, 0.0, float(in_size - 1))
    lo = jnp.floor(src)
    frac = (src - lo)[:, None]
    lo_i = lo.astype(jnp.int32)[:, None]
    hi_i = jnp.minimum(lo_i + 1, in_size - 1)
    cols = jnp.arange(in_size, dtype=jnp.int32)[None, :]
    return ((cols == lo_i).astype(jnp.float32) * (1.0 - frac)
            + (cols == hi_i).astype(jnp.float32) * frac)


@functools.lru_cache(maxsize=64)
def _build_weights(H, W, new_h, new_w, new_h_pad, new_w_pad):
    # A: (new_h_pad, H) bf16, with the 1/255 to_tensor scale folded in (in f32,
    #    before the bf16 cast); zero-padded rows produce zero output rows.
    A = _bilinear_weights(new_h, H) * (1.0 / 255.0)
    A = jnp.pad(A, ((0, new_h_pad - new_h), (0, 0))).astype(jnp.bfloat16)
    # Bt: (W, new_w_pad) bf16, transposed + lane-padded column weights.
    B = _bilinear_weights(new_w, W)
    Bt = jnp.pad(B, ((0, new_w_pad - new_w), (0, 0))).T.astype(jnp.bfloat16)
    return A, Bt


def _compute_output_size(size, h, w):
    """TF.resize size semantics: int -> shorter edge; tuple/list -> (h, w)."""
    if isinstance(size, int):
        if h <= w:
            return size, max(1, int(w * size / h))
        return max(1, int(h * size / w)), size
    return int(size[0]), int(size[1])


# --------------------------------------------------------------------------- #
# Tiling / VMEM budgeting
# --------------------------------------------------------------------------- #

_VMEM_BUDGET = 48 * 1024 * 1024   # conservative cap: headroom inside v7x's 64 MiB


def _vmem_need(row_tile, H, W, new_w_pad, cols_first):
    """Per-step VMEM footprint from per-BLOCK sizes (double-buffered) + scratch."""
    a_blk = 2 * row_tile * H * 2            # bf16 A block, double buffered
    img_blk = 2 * H * W                     # uint8 channel block, double buffered
    bt_blk = 2 * W * new_w_pad * 2          # bf16 Bt block, double buffered
    out_blk = 2 * row_tile * new_w_pad * 4  # f32 out block, double buffered
    if cols_first:
        scratch = H * new_w_pad * 2         # bf16 colres scratch
        tmp = H * new_w_pad * 4             # f32 temp of img @ Bt before the cast
    else:
        scratch = 2 * H * W                 # bf16 cast scratch
        tmp = row_tile * W * 4              # f32 temp of A_tile @ img
    return a_blk + img_blk + bt_blk + out_blk + scratch + tmp


def _pick_row_tiling(new_h, H, W, new_w_pad, cols_first, max_tile):
    """Exact row tiles (row_tile * n_row >= new_h, minimal padding), VMEM-gated."""
    new_h8 = _round_up(new_h, 8)
    cap = max_tile
    while True:
        n_row = -(-new_h8 // cap)
        row_tile = _round_up(-(-new_h8 // n_row), 8)
        if cap <= 8 or _vmem_need(row_tile, H, W, new_w_pad, cols_first) <= _VMEM_BUDGET:
            return row_tile, n_row
        cap //= 2


# --------------------------------------------------------------------------- #
# Wrapper
# --------------------------------------------------------------------------- #

def resize_to_tensor(img_hwc_u8, size):
    """Bilinear resize + to_tensor: (H, W, C) uint8 -> (C, H_out, W_out) f32 in [0, 1]."""
    H, W, C = img_hwc_u8.shape
    new_h, new_w = _compute_output_size(size, H, W)

    # Lane-pad the output width so stores are dense, unmasked vst.
    new_w_pad = _round_up(new_w, 128)

    # Contraction-order choice from static shapes: pick the ordering with fewer MXU MACs.
    new_h8 = _round_up(new_h, 8)
    flops_rows_first = new_h8 * W * (H + new_w_pad)
    flops_cols_first = new_w_pad * H * (W + new_h8)
    cols_first = flops_cols_first < flops_rows_first

    # v6e/v7x MXU is 256 wide -> 256-row tiles; v5e MXU is 128 wide -> 128.
    max_tile = 128 if _is_v5() else 256
    row_tile, n_row = _pick_row_tiling(new_h, H, W, new_w_pad, cols_first, max_tile)
    new_h_pad = row_tile * n_row           # exact tiles: no masked stores, no OOB A reads

    A, Bt = _build_weights(H, W, new_h, new_w, new_h_pad, new_w_pad)
    img_chw = jnp.transpose(img_hwc_u8, (2, 0, 1))   # uint8 CHW (stays uint8 into the kernel)
    # TODO(synk): for tiny resize targets the HWC->CHW transpose + final crop slice
    # (two extra HBM passes of XLA glue) can dominate end-to-end latency; return the
    # padded slab / feed HWC directly if the downstream pipeline tolerates it.

    need = _vmem_need(row_tile, H, W, new_w_pad, cols_first)
    vmem_limit = int(min(max(int(1.25 * need) + (4 << 20), 32 << 20), _VMEM_BUDGET))

    kernel = _cols_first_kernel if cols_first else _rows_first_kernel
    scratch = (pltpu.VMEM((H, new_w_pad), jnp.bfloat16) if cols_first
               else pltpu.VMEM((H, W), jnp.bfloat16))

    out = pl.pallas_call(
        kernel,
        out_shape=jax.ShapeDtypeStruct((C, new_h_pad, new_w_pad), jnp.float32),
        grid_spec=pltpu.PrefetchScalarGridSpec(
            num_scalar_prefetch=0,
            grid=(C, n_row),
            in_specs=[
                pl.BlockSpec((row_tile, H), lambda c, r: (r, 0)),
                pl.BlockSpec((1, H, W), lambda c, r: (c, 0, 0)),
                pl.BlockSpec((W, new_w_pad), lambda c, r: (0, 0)),
            ],
            out_specs=pl.BlockSpec((1, row_tile, new_w_pad), lambda c, r: (c, r, 0)),
            scratch_shapes=[scratch],
        ),
        compiler_params=pltpu.CompilerParams(
            # Row axis carries the once-per-channel scratch (cast / colres) -> 'arbitrary'.
            dimension_semantics=("parallel", "arbitrary"),
            vmem_limit_bytes=vmem_limit,
        ),
    )(A, img_chw, Bt)

    if new_h_pad != new_h or new_w_pad != new_w:
        out = out[:, :new_h, :new_w]
    return out


class Resize:
    """JAX/Pallas equivalent of the PyTorch Resize transform."""

    def __init__(self, size):
        self.size = size

    def __call__(self, img, bboxes):
        img = resize_to_tensor(img, self.size)
        return (img, bboxes)   # bboxes returned unchanged, as in the reference


# --------------------------------------------------------------------------- #
# Self-test
# --------------------------------------------------------------------------- #

def _reference(img_hwc_u8, size):
    """Pure-JAX f32 reference of the same (non-antialiased) bilinear + to_tensor."""
    H, W, _ = img_hwc_u8.shape
    new_h, new_w = _compute_output_size(size, H, W)
    A = _bilinear_weights(new_h, H)
    B = _bilinear_weights(new_w, W)
    return jnp.einsum("oh,hwc,pw->cop", A, img_hwc_u8.astype(jnp.float32), B) / 255.0


if __name__ == "__main__":
    key = jax.random.PRNGKey(0)
    k1, k2, k3, kbox = jax.random.split(key, 4)

    # (image HWC shape, size) -- small deterministic "PIL-like" uint8 images.
    cases = [
        ((16, 24, 3), 8),            # int-size path, rows-first order, single row tile
        ((64, 32, 3), (300, 32)),    # rows-first order with n_row > 1 (cast-hoist path)
        ((16, 192, 3), (300, 24)),   # cols-first order with n_row > 1 (colres scratch path)
    ]
    keys = [k1, k2, k3]
    bboxes = jax.random.uniform(kbox, (2, 4), dtype=jnp.float32) * 16.0

    for kk, (shape, size) in zip(keys, cases):
        img = jax.random.randint(kk, shape, 0, 256, dtype=jnp.int32).astype(jnp.uint8)
        out_img, out_boxes = Resize(size)(img, bboxes)
        jax.block_until_ready(out_img)
        jax.block_until_ready(out_boxes)

        ref = _reference(img, size)
        assert out_img.shape == ref.shape, (out_img.shape, ref.shape)
        assert out_img.dtype == jnp.float32
        assert out_boxes.shape == (2, 4)
        err = float(jnp.max(jnp.abs(out_img - ref)))
        assert err < 2e-2, err   # bf16 weight / intermediate rounding ~2^-8

    print("KERNEL_OK")
</pallas_src>

<mosaic_0001>
module attributes {stable_mosaic.version = 11 : i64} {
  func.func @_rows_first_kernel(%arg0: i32, %arg1: i32, %arg2: memref<8x16xbf16, #tpu.memory_space<vmem>>, %arg3: memref<1x16x24xi8, #tpu.memory_space<vmem>>, %arg4: memref<24x128xbf16, #tpu.memory_space<vmem>>, %arg5: memref<1x8x128xf32, #tpu.memory_space<vmem>>, %arg6: memref<16x24xbf16, #tpu.memory_space<vmem>>) attributes {dimension_semantics = [#tpu.dimension_semantics<parallel>, #tpu.dimension_semantics<arbitrary>], iteration_bounds = array<i64: 3, 1>, scalar_prefetch = 0 : i64, scratch_operands = 1 : i64, tpu.core_type = #tpu.core_type<tc>, window_params = [{transform_indices = @transform_0, window_bounds = array<i64: 8, 16>}, {transform_indices = @transform_1, window_bounds = array<i64: 1, 16, 24>}, {pipeline_mode = #tpu.pipeline_mode<synchronous>, transform_indices = @transform_2, window_bounds = array<i64: 24, 128>}, {transform_indices = @transform_3, window_bounds = array<i64: 1, 8, 128>}]} {
    %c0_i32 = arith.constant 0 : i32
    %0 = arith.cmpi eq, %arg1, %c0_i32 : i32
    %1 = arith.extui %0 : i1 to i32
    %c0_i32_0 = arith.constant 0 : i32
    %2 = arith.cmpi ne, %1, %c0_i32_0 : i32
    scf.if %2 {
      %c0_10 = arith.constant 0 : index
      %c0_11 = arith.constant 0 : index
      %c0_12 = arith.constant 0 : index
      %12 = vector.load %arg3[%c0_10, %c0_11, %c0_12] : memref<1x16x24xi8, #tpu.memory_space<vmem>>, vector<1x16x24xi8>
      %13 = vector.shape_cast %12 : vector<1x16x24xi8> to vector<16x24xi8>
      %14 = arith.uitofp %13 : vector<16x24xi8> to vector<16x24xf32>
      %15 = arith.truncf %14 : vector<16x24xf32> to vector<16x24xbf16>
      %c0_13 = arith.constant 0 : index
      %c0_14 = arith.constant 0 : index
      %16 = vector.load %arg6[%c0_13, %c0_14] : memref<16x24xbf16, #tpu.memory_space<vmem>>, vector<16x24xbf16>
      tpu.vector_store %arg6[%c0_13, %c0_14], %15 {strides = array<i32>} : memref<16x24xbf16, #tpu.memory_space<vmem>>, vector<16x24xbf16>,
    } else {
    }
    %c0 = arith.constant 0 : index
    %c0_1 = arith.constant 0 : index
    %3 = vector.load %arg2[%c0, %c0_1] : memref<8x16xbf16, #tpu.memory_space<vmem>>, vector<8x16xbf16>
    %c0_2 = arith.constant 0 : index
    %c0_3 = arith.constant 0 : index
    %4 = vector.load %arg6[%c0_2, %c0_3] : memref<16x24xbf16, #tpu.memory_space<vmem>>, vector<16x24xbf16>
    %cst = arith.constant dense<0.000000e+00> : vector<8x24xf32>
    %5 = tpu.matmul %3, %4, %cst {dimension_numbers = #tpu.dot_dimension_numbers<[1], [0], [0], [1], [0, 0, 1, 1], [], []>} : vector<8x16xbf16>, vector<16x24xbf16>, vector<8x24xf32> -> vector<8x24xf32>
    %6 = arith.truncf %5 : vector<8x24xf32> to vector<8x24xbf16>
    %c0_4 = arith.constant 0 : index
    %c0_5 = arith.constant 0 : index
    %7 = vector.load %arg4[%c0_4, %c0_5] : memref<24x128xbf16, #tpu.memory_space<vmem>>, vector<24x128xbf16>
    %cst_6 = arith.constant dense<0.000000e+00> : vector<8x128xf32>
    %8 = tpu.matmul %6, %7, %cst_6 {dimension_numbers = #tpu.dot_dimension_numbers<[1], [0], [0], [1], [0, 0, 1, 1], [], []>} : vector<8x24xbf16>, vector<24x128xbf16>, vector<8x128xf32> -> vector<8x128xf32>
    %c0_7 = arith.constant 0 : index
    %c0_8 = arith.constant 0 : index
    %c0_9 = arith.constant 0 : index
    %9 = vector.load %arg5[%c0_7, %c0_8, %c0_9] : memref<1x8x128xf32, #tpu.memory_space<vmem>>, vector<1x8x128xf32>
    %10 = vector.shape_cast %9 : vector<1x8x128xf32> to vector<8x128xf32>
    %11 = vector.shape_cast %8 : vector<8x128xf32> to vector<1x8x128xf32>
    tpu.vector_store %arg5[%c0_7, %c0_8, %c0_9], %11 {strides = array<i32>} : memref<1x8x128xf32, #tpu.memory_space<vmem>>, vector<1x8x128xf32>,
    return
  }
  func.func @transform_0(%arg0: i32, %arg1: i32) -> (i32, i32) {
    %c0_i32 = arith.constant 0 : i32
    %c0_i32_0 = arith.constant 0 : i32
    return %arg1, %c0_i32 : i32, i32
  }
  func.func @transform_1(%arg0: i32, %arg1: i32) -> (i32, i32, i32) {
    %c0_i32 = arith.constant 0 : i32
    %c0_i32_0 = arith.constant 0 : i32
    %c0_i32_1 = arith.constant 0 : i32
    return %arg0, %c0_i32, %c0_i32_0 : i32, i32, i32
  }
  func.func @transform_2(%arg0: i32, %arg1: i32) -> (i32, i32) {
    %c0_i32 = arith.constant 0 : i32
    %c0_i32_0 = arith.constant 0 : i32
    %c0_i32_1 = arith.constant 0 : i32
    return %c0_i32, %c0_i32_0 : i32, i32
  }
  func.func @transform_3(%arg0: i32, %arg1: i32) -> (i32, i32, i32) {
    %c0_i32 = arith.constant 0 : i32
    %c0_i32_0 = arith.constant 0 : i32
    return %arg0, %arg1, %c0_i32 : i32, i32, i32
  }
}

</mosaic_0001>

<bundles_post_ra>
// kernel: tpu_custom_call.1
= control target key start
LH: loop header
LB: loop body
LE: loop exit
PB: predicated region body
PF: predicated region fallthrough
CT: control target
= control target key end

     0   :  { %8 = vsyncpa [#allocation4], 0  ;;  %s1064_s0 = inlined_call_operand.hbm [shape: bf16[8,16], index: 0, kind: input, shape index: {}]   ;;  %s1065_s1 = inlined_call_operand.hbm [shape: u8[3,16,24], index: 1, kind: input, shape index: {}]   ;;  %s1066_s2 = inlined_call_operand.hbm [shape: bf16[24,128], index: 2, kind: input, shape index: {}]   ;;  %s1067_s3 = inlined_call_operand.hbm [shape: f32[3,8,128], index: 3, kind: output, shape index: {}]  }
   0x1   :  { %9 = vsyncpa [#allocation7], 0 }
   0x2   :  { %11 = vsyncpa [#allocation7 + $0x1], 0 }
   0x3   :  { %12 = vsyncpa [#allocation5], 0 }
   0x4   :  { %14 = vsyncpa [#allocation5 + $0x1], 0  ;;  %s821_s12 = smov 0   ;;  %s823_s13 = smov 0  }
   0x5   :  { %s825_s14 = smov 0   ;;  %s827_s15 = smov 0  }
   0x6   :  { %s829_s16 = smov 0   ;;  %s831_s17 = smov 0  }
   0x7 LB: > { %s852_s18 = sadd.s32 4294967295, %s789_s17   ;;  %s480_s19 = sadd.s32 4294967294, %s789_s17   ;;  %s789_s17 = sphi %s831_s17, %s20_s17   ;;  %s785_s16 = sphi %s829_s16, %s1093_s16   ;;  %s781_s15 = sphi %s827_s15, %s1092_s15   ;;  %s777_s14 = sphi %s825_s14, %s1091_s14   ;;  %s773_s13 = sphi %s823_s13, %s1090_s13   ;;  %s769_s12 = sphi %s821_s12, %s1089_s12  }
   0x8   : > { %p72_p0 = scmp.ne.s32.totalorder %s777_s14, %s773_s13  ;;  %p73_p1 = scmp.eq.s32.totalorder %s789_s17, 0 }
   0x9   : > { %p78_p2 = scmp.ne.s32.totalorder %s773_s13, %s769_s12  ;;  %p1068_p3 = scmp.eq.s32.totalorder %s852_s18, 0 }
   0xa   : > { %p861_p4 = por %p73_p1, %p72_p0  ;;  %p125_p5 = scmp.eq.s32.totalorder %s852_s18, 2 }
   0xb   : > { %p868_p6 = por %p1068_p3, %p78_p2  ;;  %p131_p7 = scmp.eq.s32.totalorder %s480_s19, 2 }
   0xc   : > { %p872_p8 = por %p125_p5, %p72_p0  ;;  %p481_p9 = scmp.ge.s32.totalorder %s789_s17, 1 }
   0xd   : > { %s1074_s21 = scalar_select %p868_p6, 1, 0 }
   0xe   : > { %s1075_s22 = scalar_select %p872_p8, 1, 0 }
   0xf   : > { %p877_p10 = por %p131_p7, %p78_p2  ;;  %p138_p11 = scmp.lt.s32.totalorder %s789_s17, 4 }
  0x10   : > { %s791_s25 = smov [#allocation8]   ;;  %p551_p0 = scmp.lt.s32.totalorder %s789_s17, 3 }
  0x11   : > { %s1076_s23 = scalar_select %p877_p10, 1, 0 }
  0x12   : > { %p882_p12 = pnand %p481_p9, %p138_p11  ;;  %s163_s26 = sshll.u32 %s791_s25, 4  ;;  %s164_s26 = int_to_ptr.vmem [resolvable:$true] %s163_s26 }
  0x13   : > { %p897_p2 = pnand %p551_p0, %p861_p4  ;;  %s613_s4 = scalar_lea.hbm %s1066_s2, 192 }
  0x14   : > { %s1077_s24 = scalar_select %p882_p12, 1, 0 }
  0x15   : > { %p534_p13 = pneg %p882_p12  ;;  %p614_p5 = scmp.ne.s32.totalorder %s1066_s2, %s613_s4 }
  0x16   : > { %s1079_s28 = scalar_select %p897_p2, 1, 0 }
  0x17   : > { %p891_p1 = pnand %p534_p13, %p1068_p3  ;;  %p620_p4 = scmp.lt.u32.totalorder %s613_s4, %s1066_s2 }
  0x19   : > { %p615_p7 = pneg %p891_p1 }
  0x1b   : > { %p616_p9 = pnand %p615_p7, %p614_p5 }
  0x1d   : > { %p617_p11 = pneg %p616_p9 }
  0x1f   : > { %p622_p13 = pnand %p620_p4, %p617_p11 }
  0x21   : > { %625 = shalt.err (!%p622_p13)
}
  0x22   : > { %s626_s9 = scalar_lea.vmem %s164_s26, 192  ;;  %p634_p8 = scmp.lt.s32.totalorder %s164_s26, %s164_s26 }
  0x23   : > { %p627_p0 = scmp.ne.s32.totalorder %s164_s26, %s626_s9  ;;  %p635_p6 = scmp.lt.s32.totalorder %s626_s9, %s626_s9 }
  0x25   : > { %p629_p3 = pnand %p627_p0, %p615_p7  ;;  %p636_p12 = por %p635_p6, %p634_p8 }
  0x27   : > { %p630_p10 = pneg %p629_p3 }
  0x29   : > { %p637_p2 = pnand %p636_p12, %p630_p10 }
  0x2b   : > { %640 = shalt.err (!%p637_p2)
}
  0x2c   : > { %s792_s10 = smov 64   ;;  %s793_s11 = smov 4  }
  0x2d   : > { %540 = dma.hbm_to_vmem [thread:$0]  (!%p891_p1), %s1066_s2, 192, %s164_s26, [#allocation7], %s792_s10, %s792_s10, %s793_s11  }
  0x2e   : > { %s794_s25 = smov [#allocation3]   ;;  %s641_s5 = scalar_lea.hbm %s1064_s0, 64 }
  0x2f   : > { %s153_s29 = sshll.u32 %s794_s25, 4  ;;  %p642_p3 = scmp.ne.s32.totalorder %s1064_s0, %s641_s5  ;;  %s154_s29 = int_to_ptr.vmem [resolvable:$true] %s153_s29 }
  0x30   : > { %p648_p10 = scmp.lt.u32.totalorder %s641_s5, %s1064_s0 }
  0x31   : > { %p644_p6 = pnand %p642_p3, %p615_p7 }
  0x33   : > { %p645_p8 = pneg %p644_p6 }
  0x35   : > { %p650_p12 = pnand %p648_p10, %p645_p8 }
  0x37   : > { %653 = shalt.err (!%p650_p12)
}
  0x38   : > { %s654_s26 = scalar_lea.vmem %s154_s29, 64  ;;  %p662_p11 = scmp.lt.s32.totalorder %s154_s29, %s154_s29 }
  0x39   : > { %p655_p2 = scmp.ne.s32.totalorder %s154_s29, %s654_s26  ;;  %p663_p4 = scmp.lt.s32.totalorder %s654_s26, %s654_s26 }
  0x3b   : > { %p657_p5 = pnand %p655_p2, %p615_p7  ;;  %p664_p13 = por %p663_p4, %p662_p11 }
  0x3d   : > { %p658_p9 = pneg %p657_p5 }
  0x3f   : > { %p665_p0 = pnand %p664_p13, %p658_p9 }
  0x41   : > { %668 = shalt.err (!%p665_p0)
}
  0x42   : > { %537 = dma.hbm_to_vmem [thread:$0]  (!%p891_p1), %s1064_s0, 64, %s154_s29, [#allocation4]  }
  0x43   : > { %s65_s19 = sadd.s32 1, %s777_s14  ;;  %s32_s20 = sadd.s32 1, %s785_s16 }
  0x44   : > { %s177_s25 = sand.u32 1, %s789_s17   ;;  %p34_p7 = scmp.ge.s32.totalorder %s32_s20, 3 }
  0x45   : > { %s179_s30 = sand.u32 1, %s777_s14   ;;  %s502_s4 = sshll.u32 %s785_s16, 6 }
  0x46   : > { %s1095_s20 = smov (%p34_p7, %s32_s20), 0  ;;  %s485_s27 = sshll.u32 %s179_s30, 2 }
  0x47   : > { %s953_s7 = scalar_lea.hbm %s1065_s1, %s502_s4  ;;  %s62_s29 = ssub.s32 %s785_s16, %s1095_s20 }
  0x48   : > { %p63_p1 = scmp.eq.s32.totalorder %s62_s29, 0  ;;  %s181_s8 = scalar_lea.vmem [#allocation6], %s485_s27 }
  0x49   : > { %s188_s9 = sshll.u32 %s181_s8, 4  ;;  %s962_s10 = scalar_lea.sflag [#allocation7], %s177_s25  ;;  %s957_s9 = int_to_ptr.vmem [resolvable:$true] %s188_s9 }
  0x4a   : > { %s960_s26 = scalar_select %p63_p1, %s777_s14, %s65_s19  }
  0x4b   : > { %s669_s11 = scalar_lea.hbm %s953_s7, 64  ;;  %p1080_p6 = scmp.ne.s32.totalorder %s1079_s28, 0 }
  0x4c   : > { %p670_p3 = scmp.ne.s32.totalorder %s953_s7, %s669_s11  ;;  %s674_s5 = scalar_lea.hbm %s1065_s1, 192 }
  0x4d   : > { %p671_p8 = pneg %p1080_p6  ;;  %p675_p2 = scmp.lt.u32.totalorder %s953_s7, %s1065_s1 }
  0x4e   : > { %p676_p5 = scmp.lt.u32.totalorder %s674_s5, %s669_s11  ;;  %p678_p11 = scmp.lt.u32.totalorder %s669_s11, %s953_s7 }
  0x4f   : > { %p672_p10 = pnand %p671_p8, %p670_p3 }
  0x50   : > { %p677_p9 = por %p676_p5, %p675_p2 }
  0x51   : > { %p673_p12 = pneg %p672_p10 }
  0x52   : > { %p679_p4 = por %p678_p11, %p677_p9 }
  0x54   : > { %p680_p13 = pnand %p679_p4, %p673_p12 }
  0x56   : > { %683 = shalt.err (!%p680_p13)
}
  0x57   : > { %s684_s19 = scalar_lea.vmem %s957_s9, 64  ;;  %s795_s25 = smov [#allocation6]  }
  0x58   : > { %p685_p0 = scmp.ne.s32.totalorder %s957_s9, %s684_s19  ;;  %s689_s29 = sshll.u32 %s795_s25, 4  ;;  %s690_s29 = int_to_ptr.vmem [resolvable:$false] %s689_s29 }
  0x59   : > { %s691_s8 = scalar_lea.vmem %s690_s29, 128  ;;  %p692_p3 = scmp.lt.s32.totalorder %s957_s9, %s690_s29 }
  0x5a   : > { %p687_p7 = pnand %p685_p0, %p671_p8  ;;  %p693_p10 = scmp.lt.s32.totalorder %s691_s8, %s684_s19 }
  0x5c   : > { %p688_p1 = pneg %p687_p7  ;;  %p694_p2 = por %p693_p10, %p692_p3 }
  0x5e   : > { %p695_p5 = pnand %p694_p2, %p688_p1 }
  0x60   : > { %698 = shalt.err (!%p695_p5)
}
  0x61   : > { %s796_s11 = smov 32   ;;  %s797_s30 = smov 2  }
  0x62   : > { %544 = dma.hbm_to_vmem [thread:$0]  (!%p1080_p6), %s953_s7, 64, %s957_s9, %s962_s10, %s796_s11, %s796_s11, %s797_s30  }
  0x63   : > { %p1081_p8 = scmp.ne.s32.totalorder %s1077_s24, 0 }
  0x64   : > { %p1082_p12 = scmp.eq.s32.totalorder (!%p1081_p8), %s852_s18, 0 }
  0x65   : > { %200 = sbr.rel (%p1081_p8) target bundleno = 575 (0x23f), region = 32 }
  0x6c   : > { %752 = dma.done.wait (%p1082_p12), [#allocation4], 64   ;;  %p1083_p9 = pmov %p1082_p12 }
  0x6d   : > { %s206_s4 = sand.u32 1, %s852_s18   ;;  %s998_s5 = sand.u32 1, %s773_s13  }
  0x6e   : > { %754 = vsyncadd (%p1083_p9), [#allocation4], 4294967232  ;;  %s490_s27 = sshll.u32 %s998_s5, 2  ;;  %s207_s6 = scalar_lea.sflag [#allocation7], %s206_s4 }
  0x6f   : > { %s210_s28 = scalar_lea.vmem [#allocation6], %s490_s27  ;;  %p1084_p6 = scmp.ne.s32.totalorder %s1074_s21, 0 }
  0x71   : > { %756 = dma.done.wait (%p1084_p6), %s207_s6, 64  }
  0x72   : > { %758 = vsyncadd (%p1084_p6), %s207_s6, 4294967232  ;;  %p1085_p11 = pmov %p1083_p9 }
  0x73   : > { %p1086_p4 = pmov %p1083_p9 }
  0x74   : > { %760 = dma.done.wait (%p1085_p11), [#allocation7], 192  }
  0x75   : > { %762 = vsyncadd (%p1086_p4), [#allocation7], 4294967104  ;;  %v798_v0 = vmov 0.0   ;;  %vm799_vm0 = vmmov 0   ;;  %v242_v1 = vld [vmem:[%s210_s28] sm:$0x3] }
  0x76   : > { %508 = vmatprep.subr.bf16.mxu0 %v798_v0  ;;  %510 = vmatprep.mubr.msk.bf16.mxu0 %vm799_vm0, %v798_v0  ;;  %v243_v2 = vld [vmem:[%s210_s28 + $0x2] sm:$0x3]  ;;  %v244_v3 = vunpack.c.l.u8.bf16 %v242_v1  ;;  %v611_v5 = vld [vmem:[#allocation8] sm:$0xff]   ;;  %vm252_vm1 = vcmask 195584   ;;  %v254_v8 = vld [vmem:[#allocation3] sm:$0xf] }
  0x77   : > { %514 = vmatprep.subr.bf16.mxu1 %v798_v0  ;;  %518 = vmatprep.mubr.msk.bf16.mxu1 %vm799_vm0, %v798_v0  ;;  %v245_v4 = vunpack.c.l.u8.bf16 %v243_v2  ;;  %vm256_vm2 = vcmask 130048   ;;  %v612_v9 = vld [vmem:[#allocation8 + $0x8] ss:$0 sps:$4 sm:$0xff]   ;;  %vm317_vm3 = vcmask 1043456   ;;  %s492_s18 = sshll.u32 %s998_s5, 3  ;;  %s499_s7 = sshll.u32 %s781_s15, 7 }
  0x78   : > { %515 = vmatpush3.bf16.msra.mxu1 %v611_v5  ;;  %v319_v10 = vsel %vm317_vm3, %v612_v9, 0  ;;  %s236_s21 = scalar_lea.vmem [#allocation9], %s492_s18  ;;  %s1018_s19 = scalar_lea.hbm %s1067_s3, %s499_s7 }
  0x79   : > { %v493_v6 = vcombine.low %v244_v3, %v245_v4  ;;  %516 = vmatprep.subr.bf16.mxu1 %v798_v0  ;;  %s377_s24 = sshll.u32 %s236_s21, 4  ;;  %s363_s25 = scalar_lea.sflag [#allocation5], %s998_s5  ;;  %s1013_s24 = int_to_ptr.vmem [resolvable:$true] %s377_s24 }
  0x7a   : > { %s699_s29 = scalar_lea.vmem %s1013_s24, 128  ;;  %p1087_p0 = scmp.ne.s32.totalorder %s1075_s22, 0 }
  0x7b   : > { %253 = vst.msk [vmem:[#allocation2] sm:$0xff] %vm252_vm1, %v493_v6  ;;  %p700_p13 = scmp.ne.s32.totalorder %s1013_s24, %s699_s29  ;;  %s800_s15 = smov [#allocation9]  }
  0x7c   : > { %517 = vmatpush3.bf16.msra.mxu1 %v319_v10  ;;  %s703_s8 = sshll.u32 %s800_s15, 4  ;;  %s704_s8 = int_to_ptr.vmem [resolvable:$false] %s703_s8 }
  0x7d   : > { %p701_p7 = pnand %p700_p13, %p1087_p0  ;;  %s705_s11 = scalar_lea.vmem %s704_s8, 256 }
  0x7e   : > { %p706_p3 = scmp.lt.s32.totalorder %s1013_s24, %s704_s8  ;;  %p707_p10 = scmp.lt.s32.totalorder %s705_s11, %s699_s29 }
  0x7f   : > { %p702_p1 = pneg %p701_p7 }
  0x80   : > { %p708_p2 = por %p707_p10, %p706_p3 }
  0x82   : > { %v255_v7 = vld [vmem:[#allocation2] sm:$0xff]  ;;  %p709_p5 = pnand %p708_p2, %p702_p1 }
  0x83   : > { %509 = vmatpush3.bf16.msra.mxu0 %v255_v7 }
  0x86   : > { %511 = vmatmul.mubr.msk.bf16.vlgmr.msra.gmra.mrb[0].mxu0 %vm256_vm2, %v254_v8 }
 0x159   : > { %v294_v11 = vpop.f32.mrb[0].mxu0 }
 0x15a   : > { %v300_v12 = vpack.c.bf16 %v294_v11, %v294_v11  ;;  %v512_v13 = vpop.f32.mrb[1].mxu0 }
 0x15b   : > { %v297_v14 = vpop.f32.mrb[2].mxu0 }
 0x15c   : > { %v513_v15 = vpop.f32.mrb[3].mxu0  ;;  %519 = vmatmul.mubr.msk.bf16.vlgmr.msra.gmra.mrb[0].mxu1 %vm252_vm1, %v300_v12 }
 0x22f   : > { %v355_v16 = vpop.f32.mrb[0].mxu1 }
 0x230   : > { %361 = vst [vmem:[%s236_s21] sm:$0xff] %v355_v16  ;;  %v520_v17 = vpop.f32.mrb[1].mxu1 }
 0x231   : > { %v358_v18 = vpop.f32.mrb[2].mxu1 }
 0x232   : > { %712 = shalt.err (!%p709_p5)
}
 0x233   : > { %s713_s30 = scalar_lea.hbm %s1018_s19, 128  ;;  %s717_s27 = scalar_lea.hbm %s1067_s3, 384 }
 0x234   : > { %p714_p8 = scmp.ne.s32.totalorder %s1018_s19, %s713_s30  ;;  %p718_p6 = scmp.lt.u32.totalorder %s1018_s19, %s1067_s3 }
 0x235   : > { %p719_p11 = scmp.lt.u32.totalorder %s717_s27, %s713_s30  ;;  %p721_p13 = scmp.lt.u32.totalorder %s713_s30, %s1018_s19 }
 0x236   : > { %p715_p12 = pnand %p714_p8, %p1087_p0 }
 0x237   : > { %p720_p4 = por %p719_p11, %p718_p6 }
 0x238   : > { %p716_p9 = pneg %p715_p12 }
 0x239   : > { %p722_p7 = por %p721_p13, %p720_p4 }
 0x23b   : > { %p723_p1 = pnand %p722_p7, %p716_p9 }
 0x23d   : > { %726 = shalt.err (!%p723_p1)
}
 0x23e   : > { %532 = dma.vmem_to_hbm [thread:$0]  (%p1087_p0), %s1013_s24, 128, %s1018_s19, %s363_s25   ;;  %v521_v19 = vpop.f32.mrb[3].mxu1 }
 0x23f PF: > { %p554_p3 = scmp.ge.s32.totalorder %s789_s17, 2  ;;  %s389_s18 = sand.u32 1, %s769_s12  }
 0x240   : > { %p1088_p10 = scmp.ne.s32.totalorder %s1076_s23, 0  ;;  %s390_s21 = scalar_lea.sflag [#allocation5], %s389_s18 }
 0x242   : > { %p546_p2 = pnand %p554_p3, %p1088_p10 }
 0x244   : > { %764 = dma.done.wait (!%p546_p2), %s390_s21, 128  }
 0x245   : > { %766 = vsyncadd (!%p546_p2), %s390_s21, 4294967168  ;;  %s20_s17 = sadd.s32 1, %s789_s17   ;;  %s1089_s12 = smov %s773_s13 }
 0x246   : > { %p17_p5 = scmp.ge.s32.totalorder %s20_s17, 5   ;;  %s1090_s13 = smov %s777_s14 }
 0x247   : > { %s1091_s14 = smov %s960_s26  ;;  %s1092_s15 = smov %s785_s16 }
 0x248   : > { %s1093_s16 = smov %s1095_s20  ;;  %19 = sbr.rel (!%p17_p5) target bundleno = 7 (0x7), region = 91 }
 0x24f   :  { %395 = vsyncpa [#allocation4], 1 }
 0x250   :  { %397 = vsyncpa [#allocation4 + $0x1], 1 }
 0x251   :  { %398 = vsyncpa [#allocation7], 1 }
 0x252   :  { %400 = vsyncpa [#allocation7 + $0x1], 1 }
 0x253   :  { %401 = vsyncpa [#allocation5], 1 }
 0x254   :  { %403 = vsyncpa [#allocation5 + $0x1], 1 }

</bundles_post_ra>
